<compile_context>
chip_gen: v7x
topology: tpu7x:2x2x1
jax: 0.10.0
libtpu: 0.0.40
codegen_flags: <defaults>
</compile_context>

<pallas_src>
import functools
import math

import jax
import jax.numpy as jnp
from jax import lax
from jax.experimental import pallas as pl
from jax.experimental.pallas import tpu as pltpu


_VMEM_LIMIT = 32 * 1024 * 1024     # explicit; equals the v7x scoped default


def _pick_lane_tile(n, want_steps=2):
    """Largest lane-dense (multiple-of-128) tile dividing n, preferring a tile
    that leaves >= want_steps grid steps.  None -> no clean tiling (XLA path)."""
    divisors = [t for t in (512, 256, 128) if n % t == 0]
    if not divisors:
        return None
    for t in divisors:
        if n // t >= want_steps:
            return t
    return divisors[0]


# -----------------------------------------------------------------------------
# Pallas kernels
# -----------------------------------------------------------------------------

def _deform_attn_kernel(q_ref, k_ref, v_ref, o_ref, *, scale, n_heads):
    # q_ref: (1, h, c, tm)  queries, channel-major (no wrapper-side transpose)
    # k_ref: (1, h, c, Nk)  keys   (resident across the query-tile grid axis)
    # v_ref: (1, h, c, Nk)  values (resident across the query-tile grid axis)
    # o_ref: (1, h, c, tm)  output, lane-dense over tm
    #
    # Softmax is omitted in the PyTorch source (result discarded), so the map is
    # linear and we may reorder:  out = (scale * V K^T) Q   (exact reassociation).
    for h in range(n_heads):                              # static, unrolled
        q = q_ref[0, h].astype(jnp.bfloat16)              # (c, tm)
        k = k_ref[0, h].astype(jnp.bfloat16)              # (c, Nk)
        v = v_ref[0, h].astype(jnp.bfloat16)              # (c, Nk)
        # vk[c, d] = sum_n v[c, n] k[d, n]   (MXU, bf16 operands, f32 acc)
        vk = lax.dot_general(v, k, dimension_numbers=(((1,), (1,)), ((), ())),
                             preferred_element_type=jnp.float32)
        vk = vk * scale                                   # tiny (c x c), f32 VPU (v5e-safe)
        # out[c, m] = sum_d vk[c, d] q[d, m]
        out = lax.dot_general(vk.astype(jnp.bfloat16), q,
                              dimension_numbers=(((1,), (0,)), ((), ())),
                              preferred_element_type=jnp.float32)
        o_ref[0, h] = out.astype(o_ref.dtype)


def deform_attn_core_pallas(q, k, v, scale):
    """Softmax-free deformable-attention core.
    q: (B, h, c, M); k, v: (B, h, c, Nk) -> out: (B, h, c, M) (channel-major)."""
    B, h, c, M = q.shape
    Nk = k.shape[-1]
    tm = _pick_lane_tile(M)
    kernel = functools.partial(_deform_attn_kernel, scale=scale, n_heads=h)
    return pl.pallas_call(
        kernel,
        out_shape=jax.ShapeDtypeStruct((B, h, c, M), q.dtype),
        grid_spec=pltpu.PrefetchScalarGridSpec(
            num_scalar_prefetch=0,
            grid=(B, M // tm),                            # >= 2 parallel steps (v7x 2 TCs)
            in_specs=[
                pl.BlockSpec((1, h, c, tm), lambda b, m: (b, 0, 0, m)),
                pl.BlockSpec((1, h, c, Nk), lambda b, m: (b, 0, 0, 0)),
                pl.BlockSpec((1, h, c, Nk), lambda b, m: (b, 0, 0, 0)),
            ],
            out_specs=pl.BlockSpec((1, h, c, tm), lambda b, m: (b, 0, 0, m)),
        ),
        compiler_params=pltpu.CompilerParams(
            dimension_semantics=("parallel", "parallel"),
            vmem_limit_bytes=_VMEM_LIMIT),
    )(q, k, v)


def _pointwise_kernel(x_ref, w_ref, b_ref, o_ref):
    # x_ref: (B, Cin, tn) f32; w_ref: (Cout, Cin) bf16 (resident);
    # b_ref: (Cout, 1) f32;    o_ref: (B, Cout, tn) f32, lane-dense over tn.
    w = w_ref[...]
    bias = b_ref[...]
    for b in range(x_ref.shape[0]):                       # static batch fold
        acc = lax.dot_general(w, x_ref[b].astype(jnp.bfloat16),
                              dimension_numbers=(((1,), (0,)), ((), ())),
                              preferred_element_type=jnp.float32)
        o_ref[b] = (acc + bias).astype(o_ref.dtype)


def pointwise_conv(x, w, b, use_pallas=True):
    """1x1 conv / token-wise Linear in channel-first layout (spatial N on lanes).
    x: (B, Cin, H, W); w: (Cout, Cin); b: (Cout,) or None -> (B, Cout, H, W)."""
    B, Cin, H, W = x.shape
    N = H * W
    Cout = w.shape[0]
    xr = x.reshape(B, Cin, N)
    bias_col = (jnp.zeros((Cout, 1), jnp.float32) if b is None
                else b.reshape(Cout, 1).astype(jnp.float32))
    tn = _pick_lane_tile(N)
    if (not use_pallas) or tn is None:
        # Tiny / lane-sparse stages: per-step Pallas overhead exceeds the work.
        out = jnp.einsum('oc,bcn->bon', w, xr) + bias_col[None]
        return out.reshape(B, Cout, H, W)
    out = pl.pallas_call(
        _pointwise_kernel,
        out_shape=jax.ShapeDtypeStruct((B, Cout, N), x.dtype),
        grid_spec=pltpu.PrefetchScalarGridSpec(
            num_scalar_prefetch=0,
            grid=(N // tn,),
            in_specs=[
                pl.BlockSpec((B, Cin, tn), lambda j: (0, 0, j)),
                pl.BlockSpec((Cout, Cin), lambda j: (0, 0)),   # weights stay resident
                pl.BlockSpec((Cout, 1), lambda j: (0, 0)),
            ],
            out_specs=pl.BlockSpec((B, Cout, tn), lambda j: (0, 0, j)),
        ),
        compiler_params=pltpu.CompilerParams(
            dimension_semantics=("parallel",),
            vmem_limit_bytes=_VMEM_LIMIT),
    )(xr, w.astype(jnp.bfloat16), bias_col)
    return out.reshape(B, Cout, H, W)


# -----------------------------------------------------------------------------
# XLA glue (no high-value Pallas mapping at these sizes)
# -----------------------------------------------------------------------------

def conv2d(x, w, b=None, stride=1, padding=0, groups=1):
    out = lax.conv_general_dilated(
        x, w,
        window_strides=(stride, stride),
        padding=((padding, padding), (padding, padding)),
        dimension_numbers=('NCHW', 'OIHW', 'NCHW'),
        feature_group_count=groups)
    if b is not None:
        out = out + b.reshape(1, -1, 1, 1)
    return out


def batch_norm_2d(x, p, eps=1e-5):
    # TODO(synk): eval-mode BatchNorm only (running stats); training-mode batch stats not implemented.
    inv = p["gamma"] / jnp.sqrt(p["var"] + eps)
    return x * inv.reshape(1, -1, 1, 1) + (p["beta"] - p["mean"] * inv).reshape(1, -1, 1, 1)


def layer_norm_last(x, gamma, beta, eps=1e-5):
    mu = jnp.mean(x, axis=-1, keepdims=True)
    var = jnp.var(x, axis=-1, keepdims=True)
    return (x - mu) / jnp.sqrt(var + eps) * gamma + beta


def layer_norm_proxy(x, gamma, beta, eps=1e-5):
    # LayerNorm over the channel axis of NCHW (== rearrange b c h w -> b h w c, LN, back).
    mu = jnp.mean(x, axis=1, keepdims=True)
    var = jnp.var(x, axis=1, keepdims=True)
    xn = (x - mu) / jnp.sqrt(var + eps)
    return xn * gamma.reshape(1, -1, 1, 1) + beta.reshape(1, -1, 1, 1)


def grid_sample_bilinear(img, grid):
    """F.grid_sample(img, grid, mode='bilinear', align_corners=True).
    img: (B, C, H, W); grid: (B, Hg, Wg, 2) with grid[...,0]=x, grid[...,1]=y in [-1,1]."""
    B, C, H, W = img.shape
    Hg, Wg = grid.shape[1], grid.shape[2]
    gx = (grid[..., 0] + 1.0) * 0.5 * (W - 1)
    gy = (grid[..., 1] + 1.0) * 0.5 * (H - 1)
    x0 = jnp.floor(gx)
    y0 = jnp.floor(gy)
    wx1 = (gx - x0)[:, None]          # (B, 1, Hg, Wg)
    wy1 = (gy - y0)[:, None]
    wx0 = 1.0 - wx1
    wy0 = 1.0 - wy1
    x0i = jnp.clip(x0, 0, W - 1).astype(jnp.int32)
    x1i = jnp.clip(x0 + 1.0, 0, W - 1).astype(jnp.int32)
    y0i = jnp.clip(y0, 0, H - 1).astype(jnp.int32)
    y1i = jnp.clip(y0 + 1.0, 0, H - 1).astype(jnp.int32)
    flat = img.reshape(B, C, H * W)

    def gather(yi, xi):
        idx = (yi * W + xi).reshape(B, 1, Hg * Wg)
        idx = jnp.broadcast_to(idx, (B, C, Hg * Wg))
        return jnp.take_along_axis(flat, idx, axis=2).reshape(B, C, Hg, Wg)

    return (wy0 * wx0 * gather(y0i, x0i) + wy0 * wx1 * gather(y0i, x1i)
            + wy1 * wx0 * gather(y1i, x0i) + wy1 * wx1 * gather(y1i, x1i))


# -----------------------------------------------------------------------------
# Module forwards (mirror the PyTorch forward passes, inference semantics)
# -----------------------------------------------------------------------------

def deformable_attention(x, p, n_heads, stride, use_pallas):
    B, C, H, W = x.shape
    hc = C // n_heads
    scale = hc ** (-0.5)
    # NOTE: DeformableAttention.norm is constructed but never used in forward().
    value = conv2d(x, p["proj_v"]["w"], p["proj_v"]["b"], 1, 1, groups=C)
    query = conv2d(x, p["proj_q"]["w"], p["proj_q"]["b"], 1, 1, groups=C)
    key = conv2d(x, p["proj_k"]["w"], p["proj_k"]["b"], stride, 1, groups=C)

    off = conv2d(x, p["off_dw"]["w"], p["off_dw"]["b"], stride, 1, groups=C)
    off = layer_norm_proxy(off, p["off_ln"]["gamma"], p["off_ln"]["beta"])
    off = jax.nn.gelu(off, approximate=False)
    off = jnp.einsum('oc,bchw->bohw', p["off_pw"]["w"], off)       # (B, 2, Hk, Wk)
    Hk, Wk = off.shape[2], off.shape[3]

    ref_y = (jnp.linspace(0.5, Hk - 0.5, Hk, dtype=x.dtype) / Hk) * 2.0 - 1.0
    ref_x = (jnp.linspace(0.5, Wk - 0.5, Wk, dtype=x.dtype) / Wk) * 2.0 - 1.0
    ref = jnp.stack(jnp.meshgrid(ref_y, ref_x, indexing="ij"), axis=-1)   # (Hk, Wk, 2)=(y,x)
    pos = jnp.tanh(jnp.transpose(off, (0, 2, 3, 1)) + ref[None])
    v_sampled = grid_sample_bilinear(value, pos[..., ::-1])               # grid order (x, y)

    M = H * W
    Nk = Hk * Wk
    q4 = query.reshape(B, n_heads, hc, M)          # pure reshapes: channel-major,
    k4 = key.reshape(B, n_heads, hc, Nk)           # no HBM-side transposes of activations
    v4 = v_sampled.reshape(B, n_heads, hc, Nk)
    if use_pallas and hc % 8 == 0 and _pick_lane_tile(M) is not None:
        out = deform_attn_core_pallas(q4, k4, v4, scale)                  # (B, h, c, M)
    else:
        # XLA fallback (and the reference path) in the original un-reordered form.
        attn = jnp.einsum('bhcm,bhcn->bhmn', q4, k4) * scale
        # `attn - F.softmax(attn, dim=2)` in the source is a discarded no-op.
        out = jnp.einsum('bhmn,bhcn->bhcm', attn, v4)
    out = out.reshape(B, C, H, W)
    return pointwise_conv(out, p["proj_out"]["w"], None, use_pallas)


def mix_feed_forward(x, p, use_pallas):
    h = pointwise_conv(x, p["fc"]["w"], p["fc"]["b"], use_pallas)         # token-wise Linear
    h = conv2d(h, p["dw"]["w"], p["dw"]["b"], 1, 1, groups=h.shape[1])
    h = layer_norm_proxy(h, p["ln"]["gamma"], p["ln"]["beta"])
    h = jax.nn.gelu(h, approximate=False)
    return pointwise_conv(h, p["pw"]["w"], p["pw"]["b"], use_pallas)


def transform_block(x, p, n_heads, stride, use_pallas):
    # TODO(synk): DropPath / dropout are training-only (identity at inference).
    # TODO(synk): norm1/norm2 could be folded into the following depthwise/1x1 weights.
    x = x + deformable_attention(batch_norm_2d(x, p["norm1"]), p["attn"], n_heads, stride, use_pallas)
    x = x + mix_feed_forward(batch_norm_2d(x, p["norm2"]), p["ffn"], use_pallas)
    return x


def downsampling(x, p, use_pallas, eps=1e-5):
    B, C, H, W = x.shape
    xh = jnp.transpose(x, (0, 2, 3, 1))
    if H % 2 == 1 or W % 2 == 1:
        xh = jnp.pad(xh, ((0, 0), (0, H % 2), (0, W % 2), (0, 0)))
    x0 = xh[:, 0::2, 0::2, :]
    x1 = xh[:, 1::2, 0::2, :]
    x2 = xh[:, 0::2, 1::2, :]
    x3 = xh[:, 1::2, 1::2, :]
    xc = jnp.transpose(jnp.concatenate([x0, x1, x2, x3], axis=-1), (0, 3, 1, 2))
    # Fold the eval-mode BatchNorm into the 1x1 reduction (exact reassociation):
    # reduction(BN(x)) = (W*inv) x + W@shift  -- removes a full-tensor VPU pass + HBM trip.
    inv = p["norm"]["gamma"] / jnp.sqrt(p["norm"]["var"] + eps)
    shift = p["norm"]["beta"] - p["norm"]["mean"] * inv
    w_fold = p["reduction"]["w"] * inv[None, :]
    b_fold = p["reduction"]["w"] @ shift
    return pointwise_conv(xc, w_fold, b_fold, use_pallas)


def basic_layer(x, p, n_heads, stride, use_pallas):
    if p["downsample"] is not None:
        x = downsampling(x, p["downsample"], use_pallas)
    for bp in p["blocks"]:
        x = transform_block(x, bp, n_heads, stride, use_pallas)
    return x


def image_to_tokens(x, p, patch_size):
    B, _, H, W = x.shape
    nH, nW = H // patch_size, W // patch_size
    pad_h = (patch_size - H % patch_size) % patch_size
    pad_w = (patch_size - W % patch_size) % patch_size
    if pad_h or pad_w:
        x = jnp.pad(x, ((0, 0), (0, 0), (0, pad_h), (0, pad_w)))
    x = conv2d(x, p["proj"]["w"], p["proj"]["b"], 1, 1)
    x = conv2d(x, p["compress"]["w"], p["compress"]["b"], patch_size, 0)
    B, C, Hp, Wp = x.shape
    tok = jnp.transpose(x.reshape(B, C, Hp * Wp), (0, 2, 1))
    tok = layer_norm_last(tok, p["norm"]["gamma"], p["norm"]["beta"])
    return tok, nH, nW


def conv_former_forward(x, params, config, use_pallas=True):
    B = x.shape[0]
    tok, nH, nW = image_to_tokens(x, params["patch_embed"], config["patch_size"])
    h = jnp.transpose(tok.reshape(B, nH, nW, -1), (0, 3, 1, 2))
    feats = []
    h = basic_layer(h, params["stage1"], config["num_heads"][0], config["stride"], use_pallas)
    feats.append(h)
    for i, lp in enumerate(params["layers"]):
        h = basic_layer(h, lp, config["num_heads"][i + 1], config["stride"], use_pallas)
        feats.append(h)
    h = batch_norm_2d(h, params["norm"])
    return h, feats


# -----------------------------------------------------------------------------
# Parameter initialization.
# The model (as written) omits the softmax, so the attention branch grows
# cubically with activation magnitude; a reduced init scale keeps the demo
# forward pass finite in f32 without touching the forward semantics.
# -----------------------------------------------------------------------------

_WEIGHT_SCALE = 0.35


def _init_conv(key, cout, cin, kh, kw, groups=1, bias=True):
    wkey, bkey = jax.random.split(key)
    fan_in = (cin // groups) * kh * kw
    bound = _WEIGHT_SCALE / math.sqrt(fan_in)
    p = {"w": jax.random.uniform(wkey, (cout, cin // groups, kh, kw), jnp.float32, -bound, bound)}
    p["b"] = (jax.random.uniform(bkey, (cout,), jnp.float32, -bound, bound) if bias else None)
    return p


def _init_linear(key, cout, cin, bias=True):
    wkey, bkey = jax.random.split(key)
    bound = _WEIGHT_SCALE / math.sqrt(cin)
    p = {"w": jax.random.uniform(wkey, (cout, cin), jnp.float32, -bound, bound)}
    p["b"] = (jax.random.uniform(bkey, (cout,), jnp.float32, -bound, bound) if bias else None)
    return p


def _init_bn(c):
    return {"gamma": jnp.ones((c,), jnp.float32), "beta": jnp.zeros((c,), jnp.float32),
            "mean": jnp.zeros((c,), jnp.float32), "var": jnp.ones((c,), jnp.float32)}


def _init_ln(c):
    return {"gamma": jnp.ones((c,), jnp.float32), "beta": jnp.zeros((c,), jnp.float32)}


def _init_attn(key, C):
    ks = jax.random.split(key, 6)
    return {
        "proj_v": _init_conv(ks[0], C, C, 3, 3, groups=C),
        "proj_q": _init_conv(ks[1], C, C, 3, 3, groups=C),
        "proj_k": _init_conv(ks[2], C, C, 3, 3, groups=C),
        "off_dw": _init_conv(ks[3], C, C, 3, 3, groups=C),
        "off_ln": _init_ln(C),
        "off_pw": _init_linear(ks[4], 2, C, bias=False),
        "proj_out": _init_linear(ks[5], C, C, bias=False),
    }


def _init_ffn(key, C, ratio):
    hid = C * ratio
    ks = jax.random.split(key, 3)
    return {"fc": _init_linear(ks[0], hid, C),
            "dw": _init_conv(ks[1], hid, hid, 3, 3, groups=hid),
            "ln": _init_ln(hid),
            "pw": _init_linear(ks[2], C, hid)}


def _init_block(key, C, ratio):
    k1, k2 = jax.random.split(key)
    return {"norm1": _init_bn(C), "norm2": _init_bn(C),
            "attn": _init_attn(k1, C), "ffn": _init_ffn(k2, C, ratio)}


def _init_basic_layer(key, C, depth, ratio, downsample):
    ks = jax.random.split(key, depth + 1)
    p = {"blocks": [_init_block(ks[i], C, ratio) for i in range(depth)], "downsample": None}
    if downsample:
        p["downsample"] = {"norm": _init_bn(2 * C),
                           "reduction": _init_linear(ks[depth], C, 2 * C, bias=False)}
    return p


def init_conv_former(key, config):
    D = config["embed_dim"]
    depths = config["depths"]
    n_layers = len(depths)
    ks = jax.random.split(key, 3 + n_layers)
    return {
        "patch_embed": {
            "proj": _init_conv(ks[0], D, config["in_c"], 3, 3),
            "compress": _init_conv(ks[1], D, D, config["patch_size"], config["patch_size"]),
            "norm": _init_ln(D),
        },
        "stage1": _init_basic_layer(ks[2], D, depths[0], config["ratio"], downsample=False),
        "layers": [
            _init_basic_layer(ks[3 + i], D * (2 ** (i + 1)), depths[i + 1],
                              config["ratio"], downsample=True)
            for i in range(n_layers - 1)
        ],
        "norm": _init_bn(D * (2 ** (n_layers - 1))),
    }


CONFIG = dict(patch_size=4, in_c=1, embed_dim=48, depths=(3, 3, 4),
              num_heads=(3, 6, 12), stride=2, ratio=2)


def _rel_err(a, b):
    return float(jnp.max(jnp.abs(a - b)) / (jnp.max(jnp.abs(b)) + 1e-6))


if __name__ == "__main__":
    key = jax.random.PRNGKey(0)
    kx, kp, kq, kk, kv = jax.random.split(key, 5)

    B, H, W = 2, 64, 64
    x = jax.random.normal(kx, (B, CONFIG["in_c"], H, W), jnp.float32)
    params = init_conv_former(kp, CONFIG)

    # Unit check: Pallas attention core (head-folded, reordered matmuls) vs
    # the original-order einsum reference (bf16 MXU tolerance).
    Bq, nh, c, M, Nk = 2, 3, 16, 256, 64
    q = jax.random.normal(kq, (Bq, nh, c, M), jnp.float32)
    k = jax.random.normal(kk, (Bq, nh, c, Nk), jnp.float32)
    v = jax.random.normal(kv, (Bq, nh, c, Nk), jnp.float32)
    out_pl = jax.block_until_ready(deform_attn_core_pallas(q, k, v, 0.25))
    attn = jnp.einsum('bhcm,bhcn->bhmn', q, k) * 0.25
    out_ref = jnp.einsum('bhmn,bhcn->bhcm', attn, v)
    assert _rel_err(out_pl, out_ref) < 5e-2, "attention kernel mismatch"

    # Unit check: Pallas pointwise (1x1 conv / Linear, bf16 operands) vs einsum.
    xw = jax.random.normal(kq, (B, 48, 16, 16), jnp.float32)
    wpw = 0.1 * jax.random.normal(kk, (96, 48), jnp.float32)
    bpw = 0.1 * jax.random.normal(kv, (96,), jnp.float32)
    pw_pl = jax.block_until_ready(pointwise_conv(xw, wpw, bpw, use_pallas=True))
    pw_ref = pointwise_conv(xw, wpw, bpw, use_pallas=False)
    assert _rel_err(pw_pl, pw_ref) < 5e-2, "pointwise kernel mismatch"

    # Full Conv_Former forward: Pallas kernels vs pure-JAX reference path.
    fwd_pallas = jax.jit(lambda xx, pp: conv_former_forward(xx, pp, CONFIG, use_pallas=True))
    fwd_ref = jax.jit(lambda xx, pp: conv_former_forward(xx, pp, CONFIG, use_pallas=False))

    out, feats = fwd_pallas(x, params)
    out = jax.block_until_ready(out)
    out_r, feats_r = fwd_ref(x, params)
    out_r = jax.block_until_ready(out_r)

    assert out.shape == (B, CONFIG["embed_dim"] * 4, H // 16, W // 16)
    assert len(feats) == len(CONFIG["depths"])
    assert bool(jnp.all(jnp.isfinite(out))), "non-finite output"
    for f_p, f_r in zip(feats, feats_r):
        assert _rel_err(f_p, f_r) < 1e-1, "per-stage mismatch vs pure-JAX reference"
    assert _rel_err(out, out_r) < 1e-1, "end-to-end mismatch vs pure-JAX reference"

    print("KERNEL_OK")
</pallas_src>

<mosaic_0001>
module attributes {stable_mosaic.version = 11 : i64} {
  func.func @_deform_attn_kernel(%arg0: i32, %arg1: i32, %arg2: memref<1x3x16x128xf32, #tpu.memory_space<vmem>>, %arg3: memref<1x3x16x64xf32, #tpu.memory_space<vmem>>, %arg4: memref<1x3x16x64xf32, #tpu.memory_space<vmem>>, %arg5: memref<1x3x16x128xf32, #tpu.memory_space<vmem>>) attributes {dimension_semantics = [#tpu.dimension_semantics<parallel>, #tpu.dimension_semantics<parallel>], iteration_bounds = array<i64: 2, 2>, scalar_prefetch = 0 : i64, scratch_operands = 0 : i64, tpu.core_type = #tpu.core_type<tc>, window_params = [{transform_indices = @transform_0, window_bounds = array<i64: 1, 3, 16, 128>}, {transform_indices = @transform_1, window_bounds = array<i64: 1, 3, 16, 64>}, {transform_indices = @transform_2, window_bounds = array<i64: 1, 3, 16, 64>}, {transform_indices = @transform_3, window_bounds = array<i64: 1, 3, 16, 128>}]} {
    %c0 = arith.constant 0 : index
    %c0_0 = arith.constant 0 : index
    %c0_1 = arith.constant 0 : index
    %c0_2 = arith.constant 0 : index
    %0 = vector.load %arg2[%c0, %c0_0, %c0_1, %c0_2] : memref<1x3x16x128xf32, #tpu.memory_space<vmem>>, vector<1x1x16x128xf32>
    %1 = vector.shape_cast %0 : vector<1x1x16x128xf32> to vector<16x128xf32>
    %2 = arith.truncf %1 : vector<16x128xf32> to vector<16x128xbf16>
    %c0_3 = arith.constant 0 : index
    %c0_4 = arith.constant 0 : index
    %c0_5 = arith.constant 0 : index
    %c0_6 = arith.constant 0 : index
    %3 = vector.load %arg3[%c0_3, %c0_4, %c0_5, %c0_6] : memref<1x3x16x64xf32, #tpu.memory_space<vmem>>, vector<1x1x16x64xf32>
    %4 = vector.shape_cast %3 : vector<1x1x16x64xf32> to vector<16x64xf32>
    %5 = arith.truncf %4 : vector<16x64xf32> to vector<16x64xbf16>
    %c0_7 = arith.constant 0 : index
    %c0_8 = arith.constant 0 : index
    %c0_9 = arith.constant 0 : index
    %c0_10 = arith.constant 0 : index
    %6 = vector.load %arg4[%c0_7, %c0_8, %c0_9, %c0_10] : memref<1x3x16x64xf32, #tpu.memory_space<vmem>>, vector<1x1x16x64xf32>
    %7 = vector.shape_cast %6 : vector<1x1x16x64xf32> to vector<16x64xf32>
    %8 = arith.truncf %7 : vector<16x64xf32> to vector<16x64xbf16>
    %cst = arith.constant dense<0.000000e+00> : vector<16x16xf32>
    %9 = tpu.matmul %8, %5, %cst {dimension_numbers = #tpu.dot_dimension_numbers<[1], [1], [0], [0], [0, 0, 1, 0], [], []>} : vector<16x64xbf16>, vector<16x64xbf16>, vector<16x16xf32> -> vector<16x16xf32>
    %cst_11 = arith.constant 2.500000e-01 : f32
    %10 = vector.broadcast %cst_11 : f32 to vector<16x16xf32>
    %11 = arith.mulf %9, %10 : vector<16x16xf32>
    %12 = arith.truncf %11 : vector<16x16xf32> to vector<16x16xbf16>
    %cst_12 = arith.constant dense<0.000000e+00> : vector<16x128xf32>
    %13 = tpu.matmul %12, %2, %cst_12 {dimension_numbers = #tpu.dot_dimension_numbers<[1], [0], [0], [1], [0, 0, 1, 1], [], []>} : vector<16x16xbf16>, vector<16x128xbf16>, vector<16x128xf32> -> vector<16x128xf32>
    %c0_13 = arith.constant 0 : index
    %c0_14 = arith.constant 0 : index
    %c0_15 = arith.constant 0 : index
    %c0_16 = arith.constant 0 : index
    %14 = vector.load %arg5[%c0_13, %c0_14, %c0_15, %c0_16] : memref<1x3x16x128xf32, #tpu.memory_space<vmem>>, vector<1x1x16x128xf32>
    %15 = vector.shape_cast %14 : vector<1x1x16x128xf32> to vector<16x128xf32>
    %16 = vector.shape_cast %13 : vector<16x128xf32> to vector<1x1x16x128xf32>
    tpu.vector_store %arg5[%c0_13, %c0_14, %c0_15, %c0_16], %16 {strides = array<i32>} : memref<1x3x16x128xf32, #tpu.memory_space<vmem>>, vector<1x1x16x128xf32>,
    %c0_17 = arith.constant 0 : index
    %c1 = arith.constant 1 : index
    %c0_18 = arith.constant 0 : index
    %c0_19 = arith.constant 0 : index
    %17 = vector.load %arg2[%c0_17, %c1, %c0_18, %c0_19] : memref<1x3x16x128xf32, #tpu.memory_space<vmem>>, vector<1x1x16x128xf32>
    %18 = vector.shape_cast %17 : vector<1x1x16x128xf32> to vector<16x128xf32>
    %19 = arith.truncf %18 : vector<16x128xf32> to vector<16x128xbf16>
    %c0_20 = arith.constant 0 : index
    %c1_21 = arith.constant 1 : index
    %c0_22 = arith.constant 0 : index
    %c0_23 = arith.constant 0 : index
    %20 = vector.load %arg3[%c0_20, %c1_21, %c0_22, %c0_23] : memref<1x3x16x64xf32, #tpu.memory_space<vmem>>, vector<1x1x16x64xf32>
    %21 = vector.shape_cast %20 : vector<1x1x16x64xf32> to vector<16x64xf32>
    %22 = arith.truncf %21 : vector<16x64xf32> to vector<16x64xbf16>
    %c0_24 = arith.constant 0 : index
    %c1_25 = arith.constant 1 : index
    %c0_26 = arith.constant 0 : index
    %c0_27 = arith.constant 0 : index
    %23 = vector.load %arg4[%c0_24, %c1_25, %c0_26, %c0_27] : memref<1x3x16x64xf32, #tpu.memory_space<vmem>>, vector<1x1x16x64xf32>
    %24 = vector.shape_cast %23 : vector<1x1x16x64xf32> to vector<16x64xf32>
    %25 = arith.truncf %24 : vector<16x64xf32> to vector<16x64xbf16>
    %cst_28 = arith.constant dense<0.000000e+00> : vector<16x16xf32>
    %26 = tpu.matmul %25, %22, %cst_28 {dimension_numbers = #tpu.dot_dimension_numbers<[1], [1], [0], [0], [0, 0, 1, 0], [], []>} : vector<16x64xbf16>, vector<16x64xbf16>, vector<16x16xf32> -> vector<16x16xf32>
    %cst_29 = arith.constant 2.500000e-01 : f32
    %27 = vector.broadcast %cst_29 : f32 to vector<16x16xf32>
    %28 = arith.mulf %26, %27 : vector<16x16xf32>
    %29 = arith.truncf %28 : vector<16x16xf32> to vector<16x16xbf16>
    %cst_30 = arith.constant dense<0.000000e+00> : vector<16x128xf32>
    %30 = tpu.matmul %29, %19, %cst_30 {dimension_numbers = #tpu.dot_dimension_numbers<[1], [0], [0], [1], [0, 0, 1, 1], [], []>} : vector<16x16xbf16>, vector<16x128xbf16>, vector<16x128xf32> -> vector<16x128xf32>
    %c0_31 = arith.constant 0 : index
    %c1_32 = arith.constant 1 : index
    %c0_33 = arith.constant 0 : index
    %c0_34 = arith.constant 0 : index
    %31 = vector.load %arg5[%c0_31, %c1_32, %c0_33, %c0_34] : memref<1x3x16x128xf32, #tpu.memory_space<vmem>>, vector<1x1x16x128xf32>
    %32 = vector.shape_cast %31 : vector<1x1x16x128xf32> to vector<16x128xf32>
    %33 = vector.shape_cast %30 : vector<16x128xf32> to vector<1x1x16x128xf32>
    tpu.vector_store %arg5[%c0_31, %c1_32, %c0_33, %c0_34], %33 {strides = array<i32>} : memref<1x3x16x128xf32, #tpu.memory_space<vmem>>, vector<1x1x16x128xf32>,
    %c0_35 = arith.constant 0 : index
    %c2 = arith.constant 2 : index
    %c0_36 = arith.constant 0 : index
    %c0_37 = arith.constant 0 : index
    %34 = vector.load %arg2[%c0_35, %c2, %c0_36, %c0_37] : memref<1x3x16x128xf32, #tpu.memory_space<vmem>>, vector<1x1x16x128xf32>
    %35 = vector.shape_cast %34 : vector<1x1x16x128xf32> to vector<16x128xf32>
    %36 = arith.truncf %35 : vector<16x128xf32> to vector<16x128xbf16>
    %c0_38 = arith.constant 0 : index
    %c2_39 = arith.constant 2 : index
    %c0_40 = arith.constant 0 : index
    %c0_41 = arith.constant 0 : index
    %37 = vector.load %arg3[%c0_38, %c2_39, %c0_40, %c0_41] : memref<1x3x16x64xf32, #tpu.memory_space<vmem>>, vector<1x1x16x64xf32>
    %38 = vector.shape_cast %37 : vector<1x1x16x64xf32> to vector<16x64xf32>
    %39 = arith.truncf %38 : vector<16x64xf32> to vector<16x64xbf16>
    %c0_42 = arith.constant 0 : index
    %c2_43 = arith.constant 2 : index
    %c0_44 = arith.constant 0 : index
    %c0_45 = arith.constant 0 : index
    %40 = vector.load %arg4[%c0_42, %c2_43, %c0_44, %c0_45] : memref<1x3x16x64xf32, #tpu.memory_space<vmem>>, vector<1x1x16x64xf32>
    %41 = vector.shape_cast %40 : vector<1x1x16x64xf32> to vector<16x64xf32>
    %42 = arith.truncf %41 : vector<16x64xf32> to vector<16x64xbf16>
    %cst_46 = arith.constant dense<0.000000e+00> : vector<16x16xf32>
    %43 = tpu.matmul %42, %39, %cst_46 {dimension_numbers = #tpu.dot_dimension_numbers<[1], [1], [0], [0], [0, 0, 1, 0], [], []>} : vector<16x64xbf16>, vector<16x64xbf16>, vector<16x16xf32> -> vector<16x16xf32>
    %cst_47 = arith.constant 2.500000e-01 : f32
    %44 = vector.broadcast %cst_47 : f32 to vector<16x16xf32>
    %45 = arith.mulf %43, %44 : vector<16x16xf32>
    %46 = arith.truncf %45 : vector<16x16xf32> to vector<16x16xbf16>
    %cst_48 = arith.constant dense<0.000000e+00> : vector<16x128xf32>
    %47 = tpu.matmul %46, %36, %cst_48 {dimension_numbers = #tpu.dot_dimension_numbers<[1], [0], [0], [1], [0, 0, 1, 1], [], []>} : vector<16x16xbf16>, vector<16x128xbf16>, vector<16x128xf32> -> vector<16x128xf32>
    %c0_49 = arith.constant 0 : index
    %c2_50 = arith.constant 2 : index
    %c0_51 = arith.constant 0 : index
    %c0_52 = arith.constant 0 : index
    %48 = vector.load %arg5[%c0_49, %c2_50, %c0_51, %c0_52] : memref<1x3x16x128xf32, #tpu.memory_space<vmem>>, vector<1x1x16x128xf32>
    %49 = vector.shape_cast %48 : vector<1x1x16x128xf32> to vector<16x128xf32>
    %50 = vector.shape_cast %47 : vector<16x128xf32> to vector<1x1x16x128xf32>
    tpu.vector_store %arg5[%c0_49, %c2_50, %c0_51, %c0_52], %50 {strides = array<i32>} : memref<1x3x16x128xf32, #tpu.memory_space<vmem>>, vector<1x1x16x128xf32>,
    return
  }
  func.func @transform_0(%arg0: i32, %arg1: i32) -> (i32, i32, i32, i32) {
    %c0_i32 = arith.constant 0 : i32
    %c0_i32_0 = arith.constant 0 : i32
    %c0_i32_1 = arith.constant 0 : i32
    return %arg0, %c0_i32, %c0_i32_0, %arg1 : i32, i32, i32, i32
  }
  func.func @transform_1(%arg0: i32, %arg1: i32) -> (i32, i32, i32, i32) {
    %c0_i32 = arith.constant 0 : i32
    %c0_i32_0 = arith.constant 0 : i32
    %c0_i32_1 = arith.constant 0 : i32
    %c0_i32_2 = arith.constant 0 : i32
    return %arg0, %c0_i32, %c0_i32_0, %c0_i32_1 : i32, i32, i32, i32
  }
  func.func @transform_2(%arg0: i32, %arg1: i32) -> (i32, i32, i32, i32) {
    %c0_i32 = arith.constant 0 : i32
    %c0_i32_0 = arith.constant 0 : i32
    %c0_i32_1 = arith.constant 0 : i32
    %c0_i32_2 = arith.constant 0 : i32
    return %arg0, %c0_i32, %c0_i32_0, %c0_i32_1 : i32, i32, i32, i32
  }
  func.func @transform_3(%arg0: i32, %arg1: i32) -> (i32, i32, i32, i32) {
    %c0_i32 = arith.constant 0 : i32
    %c0_i32_0 = arith.constant 0 : i32
    %c0_i32_1 = arith.constant 0 : i32
    return %arg0, %c0_i32, %c0_i32_0, %arg1 : i32, i32, i32, i32
  }
}

</mosaic_0001>

<bundles_post_ra>
// kernel: tpu_custom_call.1
= control target key start
LH: loop header
LB: loop body
LE: loop exit
PB: predicated region body
PF: predicated region fallthrough
CT: control target
= control target key end

     0   :  { %s1632_s0 = inlined_call_operand.hbm [shape: f32[2,3,16,256], index: 0, kind: input, shape index: {}]   ;;  %s1633_s1 = inlined_call_operand.hbm [shape: f32[2,3,16,64], index: 1, kind: input, shape index: {}]   ;;  %s1634_s2 = inlined_call_operand.hbm [shape: f32[2,3,16,64], index: 2, kind: input, shape index: {}]   ;;  %s1635_s3 = inlined_call_operand.hbm [shape: f32[2,3,16,256], index: 3, kind: output, shape index: {}]  }
   0x1   :  { %1655 = sst [smem:[#allocation18_spill]] %s1632_s0 }
   0x2   :  { %1656 = sst [smem:[#allocation19_spill]] %s1633_s1 }
   0x3   :  { %1657 = sst [smem:[#allocation20_spill]] %s1635_s3 }
   0x4   :  { %8 = vsyncpa [#allocation3], 0 }
   0x5   :  { %10 = vsyncpa [#allocation3 + $0x1], 0 }
   0x6   :  { %11 = vsyncpa [#allocation6], 0 }
   0x7   :  { %13 = vsyncpa [#allocation6 + $0x1], 0 }
   0x8   :  { %14 = vsyncpa [#allocation4], 0 }
   0x9   :  { %16 = vsyncpa [#allocation4 + $0x1], 0  ;;  %s1215_s12 = smov 0   ;;  %s1217_s13 = smov 0  }
   0xa   :  { %s1219_s14 = smov 0   ;;  %s1221_s15 = smov 0  }
   0xb   :  { %s1223_s16 = smov 0   ;;  %s1225_s17 = smov 0  }
   0xc   :  { %s1227_s18 = smov 0   ;;  %s1229_s19 = smov 0  }
   0xd   :  { %s1231_s20 = smov 0   ;;  %s1233_s21 = smov 0  }
   0xe   :  { %s1235_s22 = smov 0  }
   0xf LB: > { %1658 = sst [smem:[#allocation12_spill]] %s1153_s15  ;;  %s1269_s23 = sadd.s32 4294967295, %s1181_s22   ;;  %s1181_s22 = sphi %s1235_s22, %s22_s22   ;;  %s1177_s21 = sphi %s1233_s21, %s1706_s21   ;;  %s1173_s20 = sphi %s1231_s20, %s1705_s20   ;;  %s1169_s19 = sphi %s1229_s19, %s1704_s19   ;;  %s1165_s18 = sphi %s1227_s18, %s1703_s18   ;;  %s1161_s17 = sphi %s1225_s17, %s1702_s17   ;;  %s1157_s16 = sphi %s1223_s16, %s1701_s16   ;;  %s1153_s15 = sphi %s1221_s15, %s1700_s15   ;;  %s1149_s14 = sphi %s1219_s14, %s1699_s14   ;;  %s1145_s13 = sphi %s1217_s13, %s1698_s13   ;;  %s1141_s12 = sphi %s1215_s12, %s1697_s12  }
  0x10   : > { %1659 = sst [smem:[#allocation13_spill]] %s1165_s18  ;;  %s34_s24 = sadd.s32 1, %s1177_s21 }
  0x11   : > { %1660 = sst [smem:[#allocation14_spill]] %s1169_s19  ;;  %p1639_p0 = scmp.eq.s32.totalorder %s1181_s22, 0 }
  0x12   : > { %p1638_p1 = scmp.eq.s32.totalorder %s1269_s23, 0  ;;  %p76_p2 = scmp.ne.s32.totalorder %s1149_s14, %s1145_s13 }
  0x13   : > { %p82_p3 = scmp.ne.s32.totalorder %s1145_s13, %s1141_s12  ;;  %p1637_p5 = scmp.lt.s32.totalorder %s1181_s22, 4 }
  0x14   : > { %p78_p4 = por %p76_p2, %p1639_p0  ;;  %s182_s27 = sand.u32 1, %s1181_s22  }
  0x15   : > { %p1283_p6 = por %p82_p3, %p1638_p1  ;;  %s184_s28 = sand.u32 1, %s1149_s14  }
  0x16   : > { %s1289_s29 = smul.u32 48, %s184_s28  ;;  %p1293_p7 = pnand %p1637_p5, %p78_p4 }
  0x17   : > { %s1661_s26 = scalar_select %p1283_p6, 1, 0 }
  0x18   : > { %s1636_s4 = smul.u32 768, %s1177_s21  ;;  %s1664_s1 = sld [smem:[#allocation19_spill]] }
  0x19   : > { %1662 = sst [smem:[#allocation15_spill]] %s1661_s26  ;;  %s186_s8 = scalar_lea.vmem [#allocation5], %s1289_s29 }
  0x1a   : > { %s193_s9 = sshll.u32 %s186_s8, 4  ;;  %s1310_s10 = scalar_lea.sflag [#allocation6], %s182_s27  ;;  %s1307_s9 = int_to_ptr.vmem [resolvable:$true] %s193_s9 }
  0x1b   : > { %p1644_p11 = pneg %p1293_p7 }
  0x1e   : > { %s1304_s7 = scalar_lea.hbm %s1664_s1, %s1636_s4  ;;  %s970_s5 = scalar_lea.hbm %s1664_s1, 1536 }
  0x1f   : > { %s965_s11 = scalar_lea.hbm %s1304_s7, 768  ;;  %p971_p2 = scmp.lt.u32.totalorder %s1304_s7, %s1664_s1 }
  0x20   : > { %p966_p10 = scmp.ne.s32.totalorder %s1304_s7, %s965_s11  ;;  %p972_p3 = scmp.lt.u32.totalorder %s970_s5, %s965_s11 }
  0x21   : > { %p974_p5 = scmp.lt.u32.totalorder %s965_s11, %s1304_s7 }
  0x22   : > { %p968_p12 = pnand %p1644_p11, %p966_p10  ;;  %p973_p4 = por %p972_p3, %p971_p2 }
  0x24   : > { %p969_p13 = pneg %p968_p12  ;;  %p975_p1 = por %p974_p5, %p973_p4 }
  0x26   : > { %p976_p0 = pnand %p975_p1, %p969_p13 }
  0x28   : > { %979 = shalt.err (!%p976_p0)
}
  0x29   : > { %s980_s27 = scalar_lea.vmem %s1307_s9, 768  ;;  %s1183_s8 = smov [#allocation5]  }
  0x2a   : > { %p981_p10 = scmp.ne.s32.totalorder %s1307_s9, %s980_s27  ;;  %s985_s12 = sshll.u32 %s1183_s8, 4  ;;  %s986_s12 = int_to_ptr.vmem [resolvable:$false] %s985_s12 }
  0x2b   : > { %s987_s4 = scalar_lea.vmem %s986_s12, 1536  ;;  %p988_p9 = scmp.lt.s32.totalorder %s1307_s9, %s986_s12 }
  0x2c   : > { %p983_p12 = pnand %p981_p10, %p1644_p11  ;;  %p989_p2 = scmp.lt.s32.totalorder %s987_s4, %s980_s27 }
  0x2e   : > { %p984_p8 = pneg %p983_p12  ;;  %p990_p3 = por %p989_p2, %p988_p9 }
  0x30   : > { %p991_p5 = pnand %p990_p3, %p984_p8 }
  0x32   : > { %994 = shalt.err (!%p991_p5)
}
  0x33   : > { %s1640_s11 = smov 128   ;;  %s1642_s28 = smov 8  }
  0x34   : > { %859 = dma.hbm_to_vmem [thread:$0]  (!%p1293_p7), %s1304_s7, 768, %s1307_s9, %s1310_s10, %s1640_s11, %s1640_s11, %s1642_s28  }
  0x35   : > { %p1665_p0 = scmp.lt.s32.totalorder %s1181_s22, 5  ;;  %p1666_p1 = scmp.ge.s32.totalorder %s1181_s22, 1 }
  0x36   : > { %s756_s6 = sadd.s32 4294967294, %s1181_s22   ;;  %s31_s27 = sadd.s32 1, %s1173_s20 }
  0x37   : > { %p1345_p8 = pnand %p1666_p1, %p1665_p0  ;;  %s43_s8 = sadd.s32 1, %s1161_s17 }
  0x38   : > { %p32_p9 = scmp.ge.s32.totalorder %s31_s27, 2  ;;  %p50_p13 = scmp.ne.s32.totalorder %s1161_s17, %s1157_s16 }
  0x39   : > { %s1667_s5 = scalar_select %p1345_p8, 1, 0 }
  0x3a   : > { %p56_p4 = scmp.ne.s32.totalorder %s1157_s16, %s1153_s15  ;;  %p134_p10 = scmp.eq.s32.totalorder %s1269_s23, 3 }
  0x3b   : > { %s1708_s27 = smov (%p32_p9, %s31_s27), 0  ;;  %s1710_s24 = smov (!%p32_p9, %s34_s24), %s1177_s21 }
  0x3c   : > { %1668 = sst [smem:[#allocation16_spill]] %s1708_s27  ;;  %s39_s7 = ssub.s32 %s1173_s20, %s1708_s27 }
  0x3d   : > { %p1669_p12 = scmp.eq.s32.totalorder %s1181_s22, 0  ;;  %p36_p3 = scmp.ge.s32.totalorder %s1710_s24, 2 }
  0x3e   : > { %p1671_p5 = scmp.eq.s32.totalorder %s1269_s23, 0  ;;  %p1376_p1 = por %p134_p10, %p50_p13 }
  0x3f   : > { %p1366_p2 = por %p1669_p12, %p50_p13  ;;  %p140_p9 = scmp.eq.s32.totalorder %s756_s6, 3 }
  0x40   : > { %p1372_p0 = por %p1671_p5, %p56_p4  ;;  %s1712_s24 = smov (%p36_p3, %s1710_s24), 0 }
  0x41   : > { %s1673_s4 = scalar_select %p1376_p1, 1, 0 }
  0x42   : > { %s1672_s12 = scalar_select %p1372_p0, 1, 0 }
  0x43   : > { %1674 = sst [smem:[#allocation17_spill]] %s1673_s4  ;;  %p1382_p12 = por %p140_p9, %p56_p4 }
  0x44   : > { %s160_s28 = sand.u32 1, %s1161_s17   ;;  %s38_s25 = ssub.s32 %s1177_s21, %s1712_s24 }
  0x45   : > { %s1675_s11 = scalar_select %p1382_p12, 1, 0 }
  0x46   : > { %s40_s1 = sor.u32 %s39_s7, %s38_s25  ;;  %p67_p5 = scmp.eq.s32.totalorder %s38_s25, 0 }
  0x47   : > { %p41_p11 = scmp.eq.s32.totalorder %s40_s1, 0  ;;  %s836_s27 = smul.u32 48, %s160_s28 }
  0x48   : > { %s1676_s15 = sadd.s32 1, %s1149_s14  ;;  %s837_s4 = smul.u32 12, %s1177_s21 }
  0x49   : > { %s1392_s3 = scalar_select %p67_p5, %s1149_s14, %s1676_s15  }
  0x4a   : > { %s1395_s18 = scalar_select %p41_p11, %s1161_s17, %s43_s8  }
  0x4b   : > { %s164_s6 = scalar_lea.vmem [#allocation2], %s836_s27  ;;  %p1677_p13 = scmp.lt.s32.totalorder %s1181_s22, 4 }
  0x4c   : > { %s172_s19 = sshll.u32 %s164_s6, 4  ;;  %s169_s7 = sadd.s32 %s1173_s20, %s837_s4  ;;  %s1407_s19 = int_to_ptr.vmem [resolvable:$true] %s172_s19 }
  0x4d   : > { %p1402_p4 = pnand %p1677_p13, %p1366_p2  ;;  %s759_s1 = sshll.u32 %s169_s7, 7 }
  0x4e   : > { %s1679_s0 = sld [smem:[#allocation18_spill]]  ;;  %s1414_s27 = scalar_lea.sflag [#allocation3], %s160_s28 }
  0x4f   : > { %p997_p10 = pneg %p1402_p4 }
  0x54   : > { %s1412_s8 = scalar_lea.hbm %s1679_s0, %s759_s1  ;;  %s1000_s7 = scalar_lea.hbm %s1679_s0, 3072 }
  0x55   : > { %s995_s9 = scalar_lea.hbm %s1412_s8, 768  ;;  %p1001_p9 = scmp.lt.u32.totalorder %s1412_s8, %s1679_s0 }
  0x56   : > { %p996_p11 = scmp.ne.s32.totalorder %s1412_s8, %s995_s9  ;;  %p1002_p5 = scmp.lt.u32.totalorder %s1000_s7, %s995_s9 }
  0x57   : > { %p1004_p12 = scmp.lt.u32.totalorder %s995_s9, %s1412_s8 }
  0x58   : > { %p998_p2 = pnand %p997_p10, %p996_p11  ;;  %p1003_p13 = por %p1002_p5, %p1001_p9 }
  0x5a   : > { %p999_p3 = pneg %p998_p2  ;;  %p1005_p1 = por %p1004_p12, %p1003_p13 }
  0x5c   : > { %p1006_p6 = pnand %p1005_p1, %p999_p3 }
  0x5e   : > { %1009 = shalt.err (!%p1006_p6)
}
  0x5f   : > { %s1010_s28 = scalar_lea.vmem %s1407_s19, 768  ;;  %s1186_s15 = smov [#allocation2]  }
  0x60   : > { %p1011_p11 = scmp.ne.s32.totalorder %s1407_s19, %s1010_s28  ;;  %s1015_s4 = sshll.u32 %s1186_s15, 4  ;;  %s1016_s4 = int_to_ptr.vmem [resolvable:$false] %s1015_s4 }
  0x61   : > { %s1017_s6 = scalar_lea.vmem %s1016_s4, 1536  ;;  %p1018_p8 = scmp.lt.s32.totalorder %s1407_s19, %s1016_s4 }
  0x62   : > { %p1013_p2 = pnand %p1011_p11, %p997_p10  ;;  %p1019_p9 = scmp.lt.s32.totalorder %s1017_s6, %s1010_s28 }
  0x64   : > { %p1014_p0 = pneg %p1013_p2  ;;  %p1020_p5 = por %p1019_p9, %p1018_p8 }
  0x66   : > { %p1021_p12 = pnand %p1020_p5, %p1014_p0 }
  0x68   : > { %1024 = shalt.err (!%p1021_p12)
}
  0x69   : > { %s1187_s9 = smov 256   ;;  %s1680_s7 = smov 8  }
  0x6a   : > { %s1681_s1 = smov 128   ;;  %s1682_s25 = smul.u32 768, %s1177_s21 }
  0x6b   : > { %856 = dma.hbm_to_vmem [thread:$0]  (!%p1402_p4), %s1412_s8, 768, %s1407_s19, %s1414_s27, %s1187_s9, %s1681_s1, %s1680_s7  }
  0x6c   : > { %s1449_s28 = scalar_lea.hbm %s1634_s2, %s1682_s25  ;;  %s207_s26 = scalar_lea.vmem [#allocation7], %s1289_s29 }
  0x6d   : > { %s214_s4 = sshll.u32 %s207_s26, 4  ;;  %s1025_s6 = scalar_lea.hbm %s1449_s28, 768  ;;  %s1452_s4 = int_to_ptr.vmem [resolvable:$true] %s214_s4 }
  0x6e   : > { %p1026_p6 = scmp.ne.s32.totalorder %s1449_s28, %s1025_s6  ;;  %p1683_p8 = pneg %p1293_p7 }
  0x6f   : > { %s1030_s0 = scalar_lea.hbm %s1634_s2, 1536  ;;  %p1031_p4 = scmp.lt.u32.totalorder %s1449_s28, %s1634_s2 }
  0x70   : > { %p1028_p0 = pnand %p1026_p6, %p1683_p8  ;;  %p1032_p10 = scmp.lt.u32.totalorder %s1030_s0, %s1025_s6 }
  0x71   : > { %p1034_p13 = scmp.lt.u32.totalorder %s1025_s6, %s1449_s28 }
  0x72   : > { %p1029_p1 = pneg %p1028_p0  ;;  %p1033_p3 = por %p1032_p10, %p1031_p4 }
  0x74   : > { %p1035_p11 = por %p1034_p13, %p1033_p3 }
  0x76   : > { %p1036_p2 = pnand %p1035_p11, %p1029_p1 }
  0x78   : > { %1039 = shalt.err (!%p1036_p2)
}
  0x79   : > { %s1040_s29 = scalar_lea.vmem %s1452_s4, 768  ;;  %p1684_p5 = pmov %p1683_p8 }
  0x7a   : > { %p1041_p9 = scmp.ne.s32.totalorder %s1452_s4, %s1040_s29  ;;  %s1188_s25 = smov [#allocation7]  }
  0x7b   : > { %s1045_s15 = sshll.u32 %s1188_s25, 4  ;;  %s1046_s15 = int_to_ptr.vmem [resolvable:$false] %s1045_s15 }
  0x7c   : > { %p1043_p12 = pnand %p1041_p9, %p1684_p5  ;;  %s1047_s26 = scalar_lea.vmem %s1046_s15, 1536 }
  0x7d   : > { %p1048_p8 = scmp.lt.s32.totalorder %s1452_s4, %s1046_s15  ;;  %p1049_p0 = scmp.lt.s32.totalorder %s1047_s26, %s1040_s29 }
  0x7e   : > { %p1044_p6 = pneg %p1043_p12 }
  0x7f   : > { %p1050_p4 = por %p1049_p0, %p1048_p8 }
  0x81   : > { %p1051_p10 = pnand %p1050_p4, %p1044_p6 }
  0x83   : > { %1054 = shalt.err (!%p1051_p10)
}
  0x84   : > { %862 = dma.hbm_to_vmem [thread:$0]  (!%p1293_p7), %s1449_s28, 768, %s1452_s4, %s1310_s10, %s1681_s1, %s1681_s1, %s1680_s7  }
  0x85   : > { %p1685_p1 = scmp.ne.s32.totalorder %s1667_s5, 0 }
  0x86   : > { %s1484_s6 = sand.u32 (!%p1685_p1), 1, %s1157_s16   ;;  %p1686_p3 = scmp.ne.s32.totalorder (!%p1685_p1), %s1672_s12, 0 }
  0x87   : > { %226 = sbr.rel (%p1685_p1) target bundleno = 845 (0x34d), region = 32  ;;  %s229_s8 = scalar_lea.sflag (!%p1685_p1), [#allocation3], %s1484_s6 }
  0x88   : > { %s842_s19 = smul.u32 (!%p1685_p1), 48, %s1484_s6 }
  0x8a   : > { %s1490_s30 = scalar_lea.vmem (!%p1685_p1), [#allocation2], %s842_s19 }
  0x8e   : > { %1128 = dma.done.wait (%p1686_p3), %s229_s8, 768  }
  0x8f   : > { %1130 = vsyncadd (%p1686_p3), %s229_s8, 4294966528  ;;  %s1687_s10 = sld [smem:[#allocation15_spill]]  ;;  %s237_s5 = sand.u32 1, %s1269_s23  }
  0x90   : > { %s239_s7 = sand.u32 1, %s1145_s13   ;;  %s238_s28 = scalar_lea.sflag [#allocation6], %s237_s5 }
  0x91   : > { %s843_s1 = smul.u32 48, %s239_s7 }
  0x93   : > { %s1498_s4 = scalar_lea.vmem [#allocation5], %s843_s1 }
  0x95   : > { %p1688_p7 = scmp.ne.s32.totalorder %s1687_s10, 0 }
  0x97   : > { %1132 = dma.done.wait (%p1688_p7), %s238_s28, 1536  }
  0x98   : > { %1134 = vsyncadd (%p1688_p7), %s238_s28, 4294965760  ;;  %v1189_v0 = vmov 0.0   ;;  %vm1190_vm0 = vmmov 0   ;;  %v287_v1 = vld [vmem:[%s1498_s4] sm:$0xff]  ;;  %v288_v2 = vld [vmem:[%s1498_s4 + $0x8] sm:$0xff]  ;;  %vm293_vm1 = vcmask 523264  }
  0x99   : > { %800 = vmatprep.subr.bf16.mxu0 %v1189_v0  ;;  %802 = vmatprep.mubr.msk.bf16.mxu0 %vm1190_vm0, %v1189_v0  ;;  %v289_v3 = vpack.c.bf16 %v288_v2, %v287_v1  ;;  %v284_v4 = vld [vmem:[%s1490_s30] sm:$0xff]  ;;  %v285_v5 = vld [vmem:[%s1490_s30 + $0x8] sm:$0xff]  ;;  %s1515_s23 = scalar_lea.vmem [#allocation7], %s843_s1  ;;  %v767_v11 = vld [vmem:[%s1498_s4 + $0x10] sm:$0xff]  ;;  %vm344_vm2 = vcmask 130048   ;;  %s1547_s12 = scalar_lea.vmem [#allocation8], %s842_s19 }
  0x9a   : > { %806 = vmatprep.subr.bf16.mxu1 %v1189_v0  ;;  %808 = vmatprep.mubr.msk.bf16.mxu1 %vm1190_vm0, %v1189_v0  ;;  %v286_v6 = vpack.c.bf16 %v285_v5, %v284_v4  ;;  %v290_v8 = vld [vmem:[%s1515_s23] sm:$0xff]  ;;  %v291_v9 = vld [vmem:[%s1515_s23 + $0x8] sm:$0xff]  ;;  %v768_v12 = vld [vmem:[%s1498_s4 + $0x18] sm:$0xff]  ;;  %s1689_s0 = sld [smem:[#allocation14_spill]]  ;;  %s1690_s27 = sld [smem:[#allocation13_spill]] }
  0x9b   : > { %v298_v7 = vsel %vm293_vm1, %v289_v3, 0  ;;  %v292_v10 = vpack.c.bf16 %v291_v9, %v290_v8  ;;  %v398_v15 = vpack.c.bf16 %v768_v12, %v767_v11  ;;  %v777_v22 = vld [vmem:[%s1498_s4 + $0x20] sm:$0xff]  ;;  %v778_v23 = vld [vmem:[%s1498_s4 + $0x28] sm:$0xff]  ;;  %v769_v24 = vld [vmem:[%s1515_s23 + $0x10] sm:$0xff]  ;;  %s1691_s25 = sld [smem:[#allocation17_spill]]  ;;  %s624_s15 = sshll.u32 %s1547_s12, 4  ;;  %s1562_s15 = int_to_ptr.vmem [resolvable:$true] %s624_s15 }
  0x9c   : > { %801 = vmatpush3.bf16.xpose.msra.mxu0 %v298_v7  ;;  %807 = vmatpush3.bf16.msra.mxu1 %v286_v6  ;;  %v770_v25 = vld [vmem:[%s1515_s23 + $0x18] sm:$0xff]  ;;  %v507_v26 = vpack.c.bf16 %v778_v23, %v777_v22  ;;  %v779_v29 = vld [vmem:[%s1515_s23 + $0x20] sm:$0xff]  ;;  %v780_v30 = vld [vmem:[%s1515_s23 + $0x28] sm:$0xff]  ;;  %s610_s5 = scalar_lea.sflag [#allocation4], %s1484_s6  ;;  %s1055_s7 = scalar_lea.vmem %s1562_s15, 768 }
  0x9d   : > { %812 = vmatprep.subr.bf16.mxu1 %v1189_v0  ;;  %818 = vmatprep.subr.bf16.mxu0 %v1189_v0  ;;  %v407_v21 = vsel %vm293_vm1, %v398_v15, 0  ;;  %v402_v27 = vpack.c.bf16 %v770_v25, %v769_v24  ;;  %v511_v31 = vpack.c.bf16 %v780_v30, %v779_v29  ;;  %v765_v32 = vld [vmem:[%s1490_s30 + $0x10] sm:$0xff]  ;;  %v766_v33 = vld [vmem:[%s1490_s30 + $0x18] sm:$0xff]  ;;  %v775_v41 = vld [vmem:[%s1490_s30 + $0x20] sm:$0xff]  ;;  %p1056_p13 = scmp.ne.s32.totalorder %s1562_s15, %s1055_s7  ;;  %s1191_s1 = smov [#allocation8]  }
  0x9e   : > { %v516_v28 = vsel %vm293_vm1, %v507_v26, 0  ;;  %v394_v34 = vpack.c.bf16 %v766_v33, %v765_v32  ;;  %v776_v42 = vld [vmem:[%s1490_s30 + $0x28] sm:$0xff]  ;;  %s1692_s30 = sld [smem:[#allocation20_spill]]  ;;  %s1059_s28 = sshll.u32 %s1191_s1, 4  ;;  %s1060_s28 = int_to_ptr.vmem [resolvable:$false] %s1059_s28 }
  0x9f   : > { %v503_v47 = vpack.c.bf16 %v776_v42, %v775_v41  ;;  %s1061_s4 = scalar_lea.vmem %s1060_s28, 1536  ;;  %p1062_p5 = scmp.lt.s32.totalorder %s1562_s15, %s1060_s28 }
  0xa0   : > { %s844_s9 = smul.u32 12, %s1689_s0  ;;  %p1063_p12 = scmp.lt.s32.totalorder %s1061_s4, %s1055_s7 }
  0xa1   : > { %p1693_p11 = scmp.ne.s32.totalorder %s1691_s25, 0 }
  0xa2   : > { %s621_s29 = sadd.s32 %s1690_s27, %s844_s9  ;;  %p1064_p6 = por %p1063_p12, %p1062_p5 }
  0xa3   : > { %803 = vmatmul.mubr.msk.bf16.vlgmr.msra.gmra.mrb[0].mxu0 %vm293_vm1, %v292_v10  ;;  %s785_s26 = sshll.u32 %s621_s29, 7  ;;  %p1057_p2 = pnand %p1056_p13, %p1693_p11 }
  0xa4   : > { %820 = vmatprep.mubr.msk.bf16.mxu0 %vm1190_vm0, %v1189_v0  ;;  %819 = vmatpush3.bf16.msra.mxu0 %v394_v34  ;;  %s1567_s10 = scalar_lea.hbm %s1692_s30, %s785_s26 }
  0xa5   : > { %830 = vmatprep.subr.bf16.mxu0 %v1189_v0  ;;  %p1058_p9 = pneg %p1057_p2 }
  0xa7   : > { %p1065_p8 = pnand %p1064_p6, %p1058_p9 }
 0x176   : > { %v334_v13 = vpop.f32.mrb[0].mxu0 }
 0x177   : > { %v804_v14 = vpop.f32.mrb[1].mxu0  ;;  %v341_v17 = vmul.f32 0.25, %v334_v13 }
 0x178   : > { %v337_v16 = vpop.f32.mrb[2].mxu0 }
 0x179   : > { %v342_v18 = vmul.f32 0.25, %v337_v16  ;;  %v805_v19 = vpop.f32.mrb[3].mxu0 }
 0x17b   : > { %v343_v20 = vpack.c.bf16 %v342_v18, %v341_v17 }
 0x17d   : > { %809 = vmatmul.mubr.msk.bf16.vlgmr.msra.gmra.mrb[0].mxu1 %vm344_vm2, %v343_v20 }
 0x17e   : > { %813 = vmatpush3.bf16.xpose.msra.mxu1 %v407_v21  ;;  %814 = vmatprep.mubr.msk.bf16.mxu1 %vm1190_vm0, %v1189_v0 }
 0x17f   : > { %824 = vmatprep.subr.bf16.mxu1 %v1189_v0 }
 0x185   : > { %815 = vmatmul.mubr.msk.bf16.vlgmr.msra.gmra.mrb[4].mxu1 %vm293_vm1, %v402_v27 }
 0x186   : > { %825 = vmatpush3.bf16.xpose.msra.mxu1 %v516_v28  ;;  %826 = vmatprep.mubr.msk.bf16.mxu1 %vm1190_vm0, %v1189_v0 }
 0x18d   : > { %827 = vmatmul.mubr.msk.bf16.vlgmr.msra.gmra.mrb[8].mxu1 %vm293_vm1, %v511_v31 }
 0x250   : > { %v382_v35 = vpop.f32.mrb[0].mxu1 }
 0x251   : > { %389 = vst [vmem:[%s1547_s12] sm:$0xff] %v382_v35  ;;  %v810_v36 = vpop.f32.mrb[1].mxu1 }
 0x252   : > { %v385_v37 = vpop.f32.mrb[2].mxu1 }
 0x253   : > { %390 = vst [vmem:[%s1547_s12 + $0x8] sm:$0xff] %v385_v37  ;;  %v811_v38 = vpop.f32.mrb[3].mxu1 }
 0x258   : > { %v443_v39 = vpop.f32.mrb[4].mxu1 }
 0x259   : > { %v816_v40 = vpop.f32.mrb[5].mxu1  ;;  %v450_v44 = vmul.f32 0.25, %v443_v39 }
 0x25a   : > { %v446_v43 = vpop.f32.mrb[6].mxu1 }
 0x25b   : > { %v451_v45 = vmul.f32 0.25, %v446_v43  ;;  %v817_v46 = vpop.f32.mrb[7].mxu1 }
 0x25d   : > { %v452_v48 = vpack.c.bf16 %v451_v45, %v450_v44 }
 0x25f   : > { %821 = vmatmul.mubr.msk.bf16.vlgmr.msra.gmra.mrb[4].mxu0 %vm344_vm2, %v452_v48 }
 0x260   : > { %831 = vmatpush3.bf16.msra.mxu0 %v503_v47  ;;  %v552_v49 = vpop.f32.mrb[8].mxu1  ;;  %832 = vmatprep.mubr.msk.bf16.mxu0 %vm1190_vm0, %v1189_v0 }
 0x261   : > { %v828_v50 = vpop.f32.mrb[9].mxu1  ;;  %v559_v52 = vmul.f32 0.25, %v552_v49 }
 0x262   : > { %v555_v51 = vpop.f32.mrb[10].mxu1 }
 0x263   : > { %v560_v53 = vmul.f32 0.25, %v555_v51  ;;  %v829_v54 = vpop.f32.mrb[11].mxu1 }
 0x265   : > { %v561_v55 = vpack.c.bf16 %v560_v53, %v559_v52 }
 0x267   : > { %833 = vmatmul.mubr.msk.bf16.vlgmr.msra.gmra.mrb[8].mxu0 %vm344_vm2, %v561_v55 }
 0x332   : > { %v490_v56 = vpop.f32.mrb[4].mxu0 }
 0x333   : > { %773 = vst [vmem:[%s1547_s12 + $0x10] sm:$0xff] %v490_v56  ;;  %v822_v57 = vpop.f32.mrb[5].mxu0 }
 0x334   : > { %v493_v58 = vpop.f32.mrb[6].mxu0 }
 0x335   : > { %774 = vst [vmem:[%s1547_s12 + $0x18] sm:$0xff] %v493_v58  ;;  %v823_v59 = vpop.f32.mrb[7].mxu0 }
 0x33a   : > { %v599_v60 = vpop.f32.mrb[8].mxu0 }
 0x33b   : > { %783 = vst [vmem:[%s1547_s12 + $0x20] sm:$0xff] %v599_v60  ;;  %v834_v61 = vpop.f32.mrb[9].mxu0 }
 0x33c   : > { %v602_v62 = vpop.f32.mrb[10].mxu0 }
 0x33d   : > { %784 = vst [vmem:[%s1547_s12 + $0x28] sm:$0xff] %v602_v62  ;;  %v835_v63 = vpop.f32.mrb[11].mxu0 }
 0x33e   : > { %1068 = shalt.err (!%p1065_p8)
}
 0x33f   : > { %s1069_s23 = scalar_lea.hbm %s1567_s10, 768  ;;  %s1073_s27 = scalar_lea.hbm %s1692_s30, 3072 }
 0x340   : > { %p1070_p0 = scmp.ne.s32.totalorder %s1567_s10, %s1069_s23  ;;  %p1074_p1 = scmp.lt.u32.totalorder %s1567_s10, %s1692_s30 }
 0x341   : > { %p1075_p3 = scmp.lt.u32.totalorder %s1073_s27, %s1069_s23  ;;  %p1077_p13 = scmp.lt.u32.totalorder %s1069_s23, %s1567_s10 }
 0x342   : > { %p1071_p4 = pnand %p1070_p0, %p1693_p11 }
 0x343   : > { %p1076_p7 = por %p1075_p3, %p1074_p1 }
 0x344   : > { %p1072_p10 = pneg %p1071_p4 }
 0x345   : > { %p1078_p2 = por %p1077_p13, %p1076_p7 }
 0x347   : > { %p1079_p9 = pnand %p1078_p2, %p1072_p10 }
 0x349   : > { %1082 = shalt.err (!%p1079_p9)
}
 0x34a   : > { %s1192_s26 = smov 128   ;;  %s1193_s19 = smov 256  }
 0x34b   : > { %s1194_s8 = smov 8  }
 0x34c   : > { %851 = dma.vmem_to_hbm [thread:$0]  (%p1693_p11), %s1562_s15, 768, %s1567_s10, %s610_s5, %s1192_s26, %s1193_s19, %s1194_s8  }
 0x34d PF: > { %s1694_s7 = sld [smem:[#allocation12_spill]]  ;;  %p868_p5 = scmp.ge.s32.totalorder %s1181_s22, 2 }
 0x34e   : > { %p1695_p12 = scmp.ne.s32.totalorder %s1675_s11, 0 }
 0x350   : > { %p864_p6 = pnand %p868_p5, %p1695_p12 }
 0x353   : > { %s639_s1 = sand.u32 1, %s1694_s7  }
 0x354   : > { %s640_s28 = scalar_lea.sflag [#allocation4], %s639_s1 }
 0x355   : > { %1136 = dma.done.wait (!%p864_p6), %s640_s28, 768  }
 0x356   : > { %1138 = vsyncadd (!%p864_p6), %s640_s28, 4294966528  ;;  %s22_s22 = sadd.s32 1, %s1181_s22   ;;  %s1696_s6 = sld [smem:[#allocation16_spill]] }
 0x357   : > { %p19_p8 = scmp.ge.s32.totalorder %s22_s22, 6   ;;  %s1697_s12 = smov %s1145_s13 }
 0x358   : > { %s1698_s13 = smov %s1149_s14  ;;  %s1699_s14 = smov %s1392_s3 }
 0x359   : > { %s1700_s15 = smov %s1157_s16  ;;  %s1701_s16 = smov %s1161_s17 }
 0x35a   : > { %s1702_s17 = smov %s1395_s18  ;;  %s1703_s18 = smov %s1173_s20 }
 0x35b   : > { %s1704_s19 = smov %s1177_s21  ;;  %s1706_s21 = smov %s1712_s24 }
 0x35c   : > { %s1705_s20 = smov %s1696_s6  ;;  %21 = sbr.rel (!%p19_p8) target bundleno = 15 (0xf), region = 109 }
 0x363   :  { %645 = vsyncpa [#allocation3], 1 }
 0x364   :  { %647 = vsyncpa [#allocation3 + $0x1], 1 }
 0x365   :  { %648 = vsyncpa [#allocation6], 1 }
 0x366   :  { %650 = vsyncpa [#allocation6 + $0x1], 1 }
 0x367   :  { %651 = vsyncpa [#allocation4], 1 }
 0x368   :  { %653 = vsyncpa [#allocation4 + $0x1], 1 }

</bundles_post_ra>
